<compile_context>
chip_gen: v7x
topology: tpu7x:2x2x1
jax: 0.10.0
libtpu: 0.0.40
codegen_flags: <defaults>
</compile_context>

<pallas_src>
import functools

import numpy as np
import jax
import jax.numpy as jnp
from jax.experimental import pallas as pl
from jax.experimental.pallas import tpu as pltpu


# indices (within the 16-tuple of per-block params) that are MXU matmul weights
_MM_IDX = frozenset((2, 6, 10, 12, 14))


def _swish(x):
    return x * jax.nn.sigmoid(x)


def _shift_lanes(v, q, n):
    """y[:, i] = v[:, (i + q) mod n]; the caller masks the wrapped-in columns."""
    if q == 0:
        return v
    sh = (-q) % n
    if n % 128 == 0:
        return pltpu.roll(v, shift=sh, axis=1)       # XLU rotate (free slot)
    # tiny / unaligned lane extents: rotate via two lane slices + concat
    return jnp.concatenate([v[:, n - sh:], v[:, :n - sh]], axis=1)


def _block_body(x, tcol, poolmat, expmat, prm, *, is_first_block, downsample,
                s, k, Lo, B, taps, n_valid, pool_taps, cdt):
    """One BasicBlock on a (C, s*B*Lo) batch-folded, phase-major lane slab."""
    (bn1s, bn1b, w1, b1, bn2s, bn2b, w2, b2, bn3s, bn3b,
     w3, b3, wfc1, bfc1, wfc2, bfc2) = prm
    BLo = B * Lo

    def tap_window(src, q, nv):
        # src[:, b*Lo + t] holds the phase value at per-sample index t, sample b
        if q == 0 and nv >= Lo:
            return src
        shifted = _shift_lanes(src, q, BLo)
        tq = tcol + q                                # per-sample source index
        return jnp.where((tq >= 0) & (tq < nv), shifted, 0.0)

    h = x                                            # (C, s*BLo)
    if not is_first_block:
        h = h * bn1s + bn1b                          # bn1 (folded, eval)
        h = _swish(h)                                # activation1
        # TODO(synk): dropout (do1/do2/do3) is identity in eval mode.
    h = jnp.dot(w1, h.astype(cdt),
                preferred_element_type=jnp.float32) + b1          # conv1 (1x1)
    h = _swish(h * bn2s + bn2b)                      # bn2 + activation2

    # conv2: grouped/strided SAME conv == k dense block-diagonal matmuls over
    # roll-and-mask tap windows of the phase slabs.
    acc = None
    for j in range(k):
        q, r = taps[j]
        slab = h if s == 1 else h[:, r * BLo:(r + 1) * BLo]
        win = tap_window(slab, q, n_valid[r])
        part = jnp.dot(w2[j], win.astype(cdt), preferred_element_type=jnp.float32)
        acc = part if acc is None else acc + part
    a = _swish((acc + b2) * bn3s + bn3b)             # bn3 + activation3
    out3 = jnp.dot(w3, a.astype(cdt),
                   preferred_element_type=jnp.float32) + b3       # conv3 (1x1)

    # squeeze-excite, batched over the samples folded into the lanes
    mean = jnp.dot(out3.astype(cdt), poolmat,
                   preferred_element_type=jnp.float32)            # (C, B)
    se = _swish(jnp.dot(wfc1, mean.astype(cdt),
                        preferred_element_type=jnp.float32) + bfc1)
    se = jax.nn.sigmoid(jnp.dot(wfc2, se.astype(cdt),
                                preferred_element_type=jnp.float32) + bfc2)
    gate = jnp.dot(se.astype(cdt), expmat,
                   preferred_element_type=jnp.float32)            # (C, BLo)
    out = out3 * gate

    # identity branch (input channels already zero-padded to C by the wrapper)
    if downsample:
        ident = None
        for qp, rp in pool_taps:                     # SAME max-pool, zero pad
            slab = x if s == 1 else x[:, rp * BLo:(rp + 1) * BLo]
            cand = tap_window(slab, qp, n_valid[rp])
            ident = cand if ident is None else jnp.maximum(ident, cand)
    else:
        ident = x
    return out + ident                               # residual add in registers


def _block0_kernel(x_ref, tcol_ref, pool_ref, exp_ref, *rest, is_first_block,
                   s, k, Lo, B, taps, n_valid, pool_taps, cdt):
    prm = tuple(r[...] for r in rest[:-1])
    out_ref = rest[-1]
    out = _block_body(x_ref[0], tcol_ref[...], pool_ref[...], exp_ref[...], prm,
                      is_first_block=is_first_block, downsample=True,
                      s=s, k=k, Lo=Lo, B=B, taps=taps, n_valid=n_valid,
                      pool_taps=pool_taps, cdt=cdt)
    out_ref[0] = out.astype(out_ref.dtype)           # single full store


def _fused_kernel(x_ref, tcol_ref, pool_ref, exp_ref, *rest, nb, k, Lo, B,
                  taps, n_valid, cdt):
    prm_refs = rest[:-1]
    out_ref = rest[-1]
    tcol = tcol_ref[...]
    poolm = pool_ref[...]
    expm = exp_ref[...]
    h = x_ref[0]
    for ib in range(nb):                             # activation stays in VMEM
        prm = tuple(r[ib] for r in prm_refs)
        h = _block_body(h, tcol, poolm, expm, prm,
                        is_first_block=False, downsample=False,
                        s=1, k=k, Lo=Lo, B=B, taps=taps, n_valid=n_valid,
                        pool_taps=None, cdt=cdt)
    out_ref[0] = h.astype(out_ref.dtype)             # single full store


# ----------------------------------------------------------------------------
# Parameter preparation (BN folding, conv2 densification, channel-pad folding)
# ----------------------------------------------------------------------------
def _fold_bn(gamma, beta, mean, var, eps=1e-5):
    gamma = np.asarray(gamma, np.float32)
    beta = np.asarray(beta, np.float32)
    mean = np.asarray(mean, np.float32)
    var = np.asarray(var, np.float32)
    scale = gamma / np.sqrt(var + eps)
    return scale, beta - mean * scale


def _prep_block_params(p, *, C, Cin, ch1, Cmid, k, g):
    """Returns the 16 kernel parameter arrays (numpy float32)."""
    bn1s, bn1b = _fold_bn(*p["bn1"])                          # (Cin,)
    bn2s, bn2b = _fold_bn(*p["bn2"])                          # (Cmid,)
    bn3s, bn3b = _fold_bn(*p["bn3"])
    w1 = np.asarray(p["conv1_w"], np.float32)[:, :, 0]        # (Cmid, Cin)
    if C != Cin:                       # fold identity channel zero-pad into input
        s1 = np.ones((C,), np.float32)
        s1[ch1:ch1 + Cin] = bn1s
        sh = np.zeros((C,), np.float32)
        sh[ch1:ch1 + Cin] = bn1b
        w1p = np.zeros((Cmid, C), np.float32)
        w1p[:, ch1:ch1 + Cin] = w1
        bn1s, bn1b, w1 = s1, sh, w1p
    # grouped conv2 -> dense block-diagonal weight per tap: (k, Cmid, Cmid)
    # TODO(synk): keep per-group matmuls instead when Cmid // g >= 128.
    og = ig = Cmid // g
    w2 = np.asarray(p["conv2_w"], np.float32)                 # (Cmid, ig, k)
    w2d = np.zeros((k, Cmid, Cmid), np.float32)
    for gi in range(g):
        w2d[:, gi * og:(gi + 1) * og, gi * ig:(gi + 1) * ig] = (
            w2[gi * og:(gi + 1) * og].transpose(2, 0, 1))
    col = lambda v: np.asarray(v, np.float32).reshape(-1, 1)
    return (col(bn1s), col(bn1b), w1, col(p["conv1_b"]),
            col(bn2s), col(bn2b), w2d, col(p["conv2_b"]),
            col(bn3s), col(bn3b),
            np.asarray(p["conv3_w"], np.float32)[:, :, 0], col(p["conv3_b"]),
            np.asarray(p["fc1_w"], np.float32), col(p["fc1_b"]),
            np.asarray(p["fc2_w"], np.float32), col(p["fc2_b"]))


# ----------------------------------------------------------------------------
# BasicStage: block 0 (downsample) call + one fused call for blocks 1..m-1.
# ----------------------------------------------------------------------------
def basic_stage_pallas(x, stage_params, cfg, *, compute_dtype=jnp.float32,
                       samples_per_step=8):
    N, Cin, L = x.shape
    C = cfg["out_channels"]
    Cmid = int(C * cfg["ratio"])
    k = cfg["kernel_size"]
    g = cfg["groups"]
    s = cfg["stride"]                    # block 0 downsamples with this stride
    m_blocks = len(stage_params)
    is_first = cfg["i_stage"] == 0
    Lo = (L + s - 1) // s
    W = s * Lo
    ch1 = (C - Cin) // 2
    cdt = compute_dtype

    # --- samples per grid step: biggest divisor of N within the VMEM budget ---
    per_sample = 4 * (2 * C * s * Lo + 10 * Cmid * s * Lo + 4 * C * Lo)
    budget = 24 * 1024 * 1024            # headroom for double buffers (v7x: 64 MiB)
    B = 1
    for d in range(1, N + 1):
        if N % d == 0 and d <= samples_per_step and d * per_sample <= budget:
            B = d
    Nb = N // B
    BLo = B * Lo

    # --- small constant operands shared by both kernels -----------------------
    tcol = jnp.asarray(np.tile(np.arange(Lo, dtype=np.int32), B)[None, :])
    poolmat = jnp.asarray(np.kron(np.eye(B, dtype=np.float32),
                                  np.full((Lo, 1), 1.0 / Lo, np.float32)), cdt)
    expmat = jnp.asarray(np.kron(np.eye(B, dtype=np.float32),
                                 np.ones((1, Lo), np.float32)), cdt)

    def to_ops(prm_np):
        return [jnp.asarray(a, cdt if i in _MM_IDX else jnp.float32)
                for i, a in enumerate(prm_np)]

    def full_specs(arrs):
        return [pl.BlockSpec(a.shape, lambda n, nd=a.ndim: (0,) * nd) for a in arrs]

    def vmem_limit(ops):
        byt = sum(int(np.prod(a.shape)) * a.dtype.itemsize for a in ops)
        working = 2 * byt + 2 * C * BLo * 4 + 12 * Cmid * s * BLo * 4
        if working <= 12 * 1024 * 1024:
            return None                  # default scoped VMEM is plenty
        return int(min(48 * 1024 * 1024, 2 * working))

    se_flops = 2 * (C * BLo * B + 2 * C * (C // 2) * B + C * B * BLo)
    se_trans = (C // 2) * B + 2 * C * B

    # --- block 0 tap schedules (phase-major coordinates) ----------------------
    p2 = max(0, (Lo - 1) * s + k - L)
    padl = p2 // 2
    taps0 = tuple(((j - padl) // s, (j - padl) % s) for j in range(k))
    nv0 = tuple(max(0, min(Lo, (L - r + s - 1) // s)) for r in range(s))
    plp = (s - 1) // 2
    pool_taps0 = tuple(((t - plp) // s, (t - plp) % s) for t in range(s))

    # --- block 0 input: channel pad to C, phase-major batch-folded lanes ------
    xk = x.astype(jnp.float32)
    if C != Cin:
        xk = jnp.pad(xk, ((0, 0), (ch1, C - Cin - ch1), (0, 0)))
    if W > L:
        xk = jnp.pad(xk, ((0, 0), (0, 0), (0, W - L)))
    xk = xk.reshape(Nb, B, C, Lo, s).transpose(0, 2, 4, 1, 3).reshape(Nb, C, s * BLo)

    prm0 = to_ops(_prep_block_params(stage_params[0], C=C, Cin=Cin, ch1=ch1,
                                     Cmid=Cmid, k=k, g=g))
    ops0 = [xk, tcol, poolmat, expmat] + prm0
    flops0 = Nb * (2 * BLo * (Cmid * C * s + k * Cmid * Cmid + C * Cmid) + se_flops)
    trans0 = Nb * ((0 if is_first else C * s * BLo)
                   + Cmid * s * BLo + Cmid * BLo + se_trans)
    cost0 = pl.CostEstimate(
        flops=int(flops0), transcendentals=int(trans0),
        bytes_accessed=int(sum(int(np.prod(a.shape)) * a.dtype.itemsize
                               for a in ops0) + Nb * C * BLo * 4))
    y = pl.pallas_call(
        functools.partial(_block0_kernel, is_first_block=is_first, s=s, k=k,
                          Lo=Lo, B=B, taps=taps0, n_valid=nv0,
                          pool_taps=pool_taps0, cdt=cdt),
        out_shape=jax.ShapeDtypeStruct((Nb, C, BLo), jnp.float32),
        grid_spec=pltpu.PrefetchScalarGridSpec(
            num_scalar_prefetch=0, grid=(Nb,),
            in_specs=[pl.BlockSpec((1, C, s * BLo), lambda n: (n, 0, 0))]
                     + full_specs(ops0[1:]),
            out_specs=pl.BlockSpec((1, C, BLo), lambda n: (n, 0, 0))),
        compiler_params=pltpu.CompilerParams(
            dimension_semantics=("parallel",), vmem_limit_bytes=vmem_limit(ops0)),
        cost_estimate=cost0,
    )(*ops0)

    # --- blocks 1..m-1: stride-1, fused into one call (VMEM-resident act) -----
    if m_blocks > 1:
        nb = m_blocks - 1
        padl1 = (k - 1) // 2
        taps1 = tuple((j - padl1, 0) for j in range(k))
        per_blk = [to_ops(_prep_block_params(stage_params[i], C=C, Cin=C, ch1=0,
                                             Cmid=Cmid, k=k, g=g))
                   for i in range(1, m_blocks)]
        stacked = [jnp.stack([pb[j] for pb in per_blk])
                   for j in range(len(per_blk[0]))]
        ops1 = [y, tcol, poolmat, expmat] + stacked
        flops1 = Nb * nb * (2 * BLo * (Cmid * C + k * Cmid * Cmid + C * Cmid)
                            + se_flops)
        trans1 = Nb * nb * (C * BLo + 2 * Cmid * BLo + se_trans)
        cost1 = pl.CostEstimate(
            flops=int(flops1), transcendentals=int(trans1),
            bytes_accessed=int(sum(int(np.prod(a.shape)) * a.dtype.itemsize
                                   for a in ops1) + Nb * C * BLo * 4))
        y = pl.pallas_call(
            functools.partial(_fused_kernel, nb=nb, k=k, Lo=Lo, B=B,
                              taps=taps1, n_valid=(Lo,), cdt=cdt),
            out_shape=jax.ShapeDtypeStruct((Nb, C, BLo), jnp.float32),
            grid_spec=pltpu.PrefetchScalarGridSpec(
                num_scalar_prefetch=0, grid=(Nb,),
                in_specs=[pl.BlockSpec((1, C, BLo), lambda n: (n, 0, 0))]
                         + full_specs(ops1[1:]),
                out_specs=pl.BlockSpec((1, C, BLo), lambda n: (n, 0, 0))),
            compiler_params=pltpu.CompilerParams(
                dimension_semantics=("parallel",),
                vmem_limit_bytes=vmem_limit(ops1)),
            cost_estimate=cost1,
        )(*ops1)

    # --- unfold (Nb, C, B*Lo) -> (N, C, Lo) ------------------------------------
    return y.reshape(Nb, C, B, Lo).transpose(0, 2, 1, 3).reshape(N, C, Lo)


# ----------------------------------------------------------------------------
# Pure-JAX reference (mirrors the PyTorch modules, NCL layout), for checking.
# ----------------------------------------------------------------------------
def _bn_ref(x, gamma, beta, mean, var, eps=1e-5):
    return ((x - mean[None, :, None]) / jnp.sqrt(var[None, :, None] + eps)
            * gamma[None, :, None] + beta[None, :, None])


def _conv1d_same_ref(x, w, b, stride, groups):
    N, Cin, L = x.shape
    Cout, ig, k = w.shape
    Lo = (L + stride - 1) // stride
    p = max(0, (Lo - 1) * stride + k - L)
    pad_l, pad_r = p // 2, p - p // 2
    xp = jnp.pad(x, ((0, 0), (0, 0), (pad_l, pad_r)))
    og = Cout // groups
    outs = []
    for gi in range(groups):
        xg = xp[:, gi * ig:(gi + 1) * ig, :]
        wg = w[gi * og:(gi + 1) * og]
        acc = jnp.zeros((N, og, Lo), jnp.float32)
        for j in range(k):
            win = xg[:, :, j:j + (Lo - 1) * stride + 1:stride]
            acc = acc + jnp.einsum("nil,oi->nol", win, wg[:, :, j])
        outs.append(acc)
    return jnp.concatenate(outs, axis=1) + b[None, :, None]


def _maxpool_same_ref(x, ksize):
    N, C, L = x.shape
    p = max(0, ksize - 1)
    pad_l, pad_r = p // 2, p - p // 2
    xp = jnp.pad(x, ((0, 0), (0, 0), (pad_l, pad_r)))
    Lo = (L + p - ksize) // ksize + 1
    wins = [xp[:, :, j:j + (Lo - 1) * ksize + 1:ksize] for j in range(ksize)]
    return jnp.max(jnp.stack(wins, 0), axis=0)


def basic_block_ref(x, p, *, in_channels, out_channels, ratio, kernel_size,
                    stride, groups, downsample, is_first_block):
    s = stride if downsample else 1
    out = x
    if not is_first_block:
        out = _bn_ref(out, *p["bn1"])
        out = out * jax.nn.sigmoid(out)
    out = _conv1d_same_ref(out, p["conv1_w"], p["conv1_b"], 1, 1)
    out = _bn_ref(out, *p["bn2"]); out = out * jax.nn.sigmoid(out)
    out = _conv1d_same_ref(out, p["conv2_w"], p["conv2_b"], s, groups)
    out = _bn_ref(out, *p["bn3"]); out = out * jax.nn.sigmoid(out)
    out = _conv1d_same_ref(out, p["conv3_w"], p["conv3_b"], 1, 1)
    se = out.mean(-1)
    se = se @ p["fc1_w"].T + p["fc1_b"]; se = se * jax.nn.sigmoid(se)
    se = se @ p["fc2_w"].T + p["fc2_b"]; se = jax.nn.sigmoid(se)
    out = out * se[:, :, None]
    identity = x
    if downsample:
        identity = _maxpool_same_ref(identity, s)
    if out_channels != in_channels:
        ch1 = (out_channels - in_channels) // 2
        ch2 = out_channels - in_channels - ch1
        identity = jnp.pad(identity, ((0, 0), (ch1, ch2), (0, 0)))
    return out + identity


def basic_stage_ref(x, stage_params, cfg):
    out = x
    for i_block, p in enumerate(stage_params):
        out = basic_block_ref(
            out, p,
            in_channels=cfg["in_channels"] if i_block == 0 else cfg["out_channels"],
            out_channels=cfg["out_channels"], ratio=cfg["ratio"],
            kernel_size=cfg["kernel_size"],
            stride=cfg["stride"] if i_block == 0 else 1,
            groups=cfg["groups"],
            downsample=(i_block == 0),
            is_first_block=(cfg["i_stage"] == 0 and i_block == 0))
    return out


# ----------------------------------------------------------------------------
# Deterministic synthetic parameters for one BasicBlock.
# ----------------------------------------------------------------------------
def init_params(key, Cin, Cout, Cmid, k, g):
    ks = jax.random.split(key, 13)

    def nrm(kk, shape, sc=0.3):
        return (sc * jax.random.normal(kk, shape)).astype(jnp.float32)

    def bn(kk, C):
        k1, k2, k3, k4 = jax.random.split(kk, 4)
        gamma = (1.0 + 0.1 * jax.random.normal(k1, (C,))).astype(jnp.float32)
        beta = (0.1 * jax.random.normal(k2, (C,))).astype(jnp.float32)
        mean = (0.1 * jax.random.normal(k3, (C,))).astype(jnp.float32)
        var = (0.9 + 0.1 * jnp.abs(jax.random.normal(k4, (C,)))).astype(jnp.float32)
        return (gamma, beta, mean, var)

    return {
        "bn1": bn(ks[0], Cin),
        "conv1_w": nrm(ks[1], (Cmid, Cin, 1)),
        "conv1_b": nrm(ks[2], (Cmid,), 0.1),
        "bn2": bn(ks[3], Cmid),
        "conv2_w": nrm(ks[4], (Cmid, Cmid // g, k)),
        "conv2_b": nrm(ks[5], (Cmid,), 0.1),
        "bn3": bn(ks[6], Cmid),
        "conv3_w": nrm(ks[7], (Cout, Cmid, 1)),
        "conv3_b": nrm(ks[8], (Cout,), 0.1),
        "fc1_w": nrm(ks[9], (Cout // 2, Cout)),
        "fc1_b": nrm(ks[10], (Cout // 2,), 0.1),
        "fc2_w": nrm(ks[11], (Cout, Cout // 2)),
        "fc2_b": nrm(ks[12], (Cout,), 0.1),
    }


if __name__ == "__main__":
    cfg = dict(in_channels=4, out_channels=8, ratio=1.0, kernel_size=3, stride=2,
               groups=2, i_stage=0, m_blocks=2)
    N, L = 2, 16
    Cmid = int(cfg["out_channels"] * cfg["ratio"])

    key = jax.random.PRNGKey(0)
    kx, kp = jax.random.split(key)
    x = jax.random.normal(kx, (N, cfg["in_channels"], L), jnp.float32)

    stage_params = []
    kp_blocks = jax.random.split(kp, cfg["m_blocks"])
    for i in range(cfg["m_blocks"]):
        cin_i = cfg["in_channels"] if i == 0 else cfg["out_channels"]
        stage_params.append(init_params(kp_blocks[i], cin_i, cfg["out_channels"],
                                        Cmid, cfg["kernel_size"], cfg["groups"]))

    out = basic_stage_pallas(x, stage_params, cfg)      # f32 compute (default)
    out = jax.block_until_ready(out)

    ref = basic_stage_ref(x, stage_params, cfg)
    np.testing.assert_allclose(np.asarray(out), np.asarray(ref), rtol=1e-3, atol=1e-3)
    print("KERNEL_OK")
</pallas_src>

<mosaic_0001>
module attributes {stable_mosaic.version = 11 : i64} {
  func.func @_block0_kernel(%arg0: i32, %arg1: memref<1x8x32xf32, #tpu.memory_space<vmem>>, %arg2: memref<1x16xi32, #tpu.memory_space<vmem>>, %arg3: memref<16x2xf32, #tpu.memory_space<vmem>>, %arg4: memref<2x16xf32, #tpu.memory_space<vmem>>, %arg5: memref<8x1xf32, #tpu.memory_space<vmem>>, %arg6: memref<8x1xf32, #tpu.memory_space<vmem>>, %arg7: memref<8x8xf32, #tpu.memory_space<vmem>>, %arg8: memref<8x1xf32, #tpu.memory_space<vmem>>, %arg9: memref<8x1xf32, #tpu.memory_space<vmem>>, %arg10: memref<8x1xf32, #tpu.memory_space<vmem>>, %arg11: memref<3x8x8xf32, #tpu.memory_space<vmem>>, %arg12: memref<8x1xf32, #tpu.memory_space<vmem>>, %arg13: memref<8x1xf32, #tpu.memory_space<vmem>>, %arg14: memref<8x1xf32, #tpu.memory_space<vmem>>, %arg15: memref<8x8xf32, #tpu.memory_space<vmem>>, %arg16: memref<8x1xf32, #tpu.memory_space<vmem>>, %arg17: memref<4x8xf32, #tpu.memory_space<vmem>>, %arg18: memref<4x1xf32, #tpu.memory_space<vmem>>, %arg19: memref<8x4xf32, #tpu.memory_space<vmem>>, %arg20: memref<8x1xf32, #tpu.memory_space<vmem>>, %arg21: memref<1x8x16xf32, #tpu.memory_space<vmem>>) attributes {dimension_semantics = [#tpu.dimension_semantics<parallel>], iteration_bounds = array<i64: 1>, scalar_prefetch = 0 : i64, scratch_operands = 0 : i64, tpu.core_type = #tpu.core_type<tc>, window_params = [{transform_indices = @transform_0, window_bounds = array<i64: 1, 8, 32>}, {pipeline_mode = #tpu.pipeline_mode<synchronous>, transform_indices = @transform_1, window_bounds = array<i64: 1, 16>}, {pipeline_mode = #tpu.pipeline_mode<synchronous>, transform_indices = @transform_2, window_bounds = array<i64: 16, 2>}, {pipeline_mode = #tpu.pipeline_mode<synchronous>, transform_indices = @transform_3, window_bounds = array<i64: 2, 16>}, {pipeline_mode = #tpu.pipeline_mode<synchronous>, transform_indices = @transform_4, window_bounds = array<i64: 8, 1>}, {pipeline_mode = #tpu.pipeline_mode<synchronous>, transform_indices = @transform_5, window_bounds = array<i64: 8, 1>}, {pipeline_mode = #tpu.pipeline_mode<synchronous>, transform_indices = @transform_6, window_bounds = array<i64: 8, 8>}, {pipeline_mode = #tpu.pipeline_mode<synchronous>, transform_indices = @transform_7, window_bounds = array<i64: 8, 1>}, {pipeline_mode = #tpu.pipeline_mode<synchronous>, transform_indices = @transform_8, window_bounds = array<i64: 8, 1>}, {pipeline_mode = #tpu.pipeline_mode<synchronous>, transform_indices = @transform_9, window_bounds = array<i64: 8, 1>}, {pipeline_mode = #tpu.pipeline_mode<synchronous>, transform_indices = @transform_10, window_bounds = array<i64: 3, 8, 8>}, {pipeline_mode = #tpu.pipeline_mode<synchronous>, transform_indices = @transform_11, window_bounds = array<i64: 8, 1>}, {pipeline_mode = #tpu.pipeline_mode<synchronous>, transform_indices = @transform_12, window_bounds = array<i64: 8, 1>}, {pipeline_mode = #tpu.pipeline_mode<synchronous>, transform_indices = @transform_13, window_bounds = array<i64: 8, 1>}, {pipeline_mode = #tpu.pipeline_mode<synchronous>, transform_indices = @transform_14, window_bounds = array<i64: 8, 8>}, {pipeline_mode = #tpu.pipeline_mode<synchronous>, transform_indices = @transform_15, window_bounds = array<i64: 8, 1>}, {pipeline_mode = #tpu.pipeline_mode<synchronous>, transform_indices = @transform_16, window_bounds = array<i64: 4, 8>}, {pipeline_mode = #tpu.pipeline_mode<synchronous>, transform_indices = @transform_17, window_bounds = array<i64: 4, 1>}, {pipeline_mode = #tpu.pipeline_mode<synchronous>, transform_indices = @transform_18, window_bounds = array<i64: 8, 4>}, {pipeline_mode = #tpu.pipeline_mode<synchronous>, transform_indices = @transform_19, window_bounds = array<i64: 8, 1>}, {transform_indices = @transform_20, window_bounds = array<i64: 1, 8, 16>}]} {
    %c0 = arith.constant 0 : index
    %c0_0 = arith.constant 0 : index
    %0 = vector.load %arg7[%c0, %c0_0] : memref<8x8xf32, #tpu.memory_space<vmem>>, vector<8x8xf32>
    %c0_1 = arith.constant 0 : index
    %c0_2 = arith.constant 0 : index
    %1 = vector.load %arg8[%c0_1, %c0_2] : memref<8x1xf32, #tpu.memory_space<vmem>>, vector<8x1xf32>
    %c0_3 = arith.constant 0 : index
    %c0_4 = arith.constant 0 : index
    %2 = vector.load %arg9[%c0_3, %c0_4] : memref<8x1xf32, #tpu.memory_space<vmem>>, vector<8x1xf32>
    %c0_5 = arith.constant 0 : index
    %c0_6 = arith.constant 0 : index
    %3 = vector.load %arg10[%c0_5, %c0_6] : memref<8x1xf32, #tpu.memory_space<vmem>>, vector<8x1xf32>
    %c0_7 = arith.constant 0 : index
    %c0_8 = arith.constant 0 : index
    %c0_9 = arith.constant 0 : index
    %4 = vector.load %arg11[%c0_7, %c0_8, %c0_9] : memref<3x8x8xf32, #tpu.memory_space<vmem>>, vector<3x8x8xf32>
    %c0_10 = arith.constant 0 : index
    %c0_11 = arith.constant 0 : index
    %5 = vector.load %arg12[%c0_10, %c0_11] : memref<8x1xf32, #tpu.memory_space<vmem>>, vector<8x1xf32>
    %c0_12 = arith.constant 0 : index
    %c0_13 = arith.constant 0 : index
    %6 = vector.load %arg13[%c0_12, %c0_13] : memref<8x1xf32, #tpu.memory_space<vmem>>, vector<8x1xf32>
    %c0_14 = arith.constant 0 : index
    %c0_15 = arith.constant 0 : index
    %7 = vector.load %arg14[%c0_14, %c0_15] : memref<8x1xf32, #tpu.memory_space<vmem>>, vector<8x1xf32>
    %c0_16 = arith.constant 0 : index
    %c0_17 = arith.constant 0 : index
    %8 = vector.load %arg15[%c0_16, %c0_17] : memref<8x8xf32, #tpu.memory_space<vmem>>, vector<8x8xf32>
    %c0_18 = arith.constant 0 : index
    %c0_19 = arith.constant 0 : index
    %9 = vector.load %arg16[%c0_18, %c0_19] : memref<8x1xf32, #tpu.memory_space<vmem>>, vector<8x1xf32>
    %c0_20 = arith.constant 0 : index
    %c0_21 = arith.constant 0 : index
    %10 = vector.load %arg17[%c0_20, %c0_21] : memref<4x8xf32, #tpu.memory_space<vmem>>, vector<4x8xf32>
    %c0_22 = arith.constant 0 : index
    %c0_23 = arith.constant 0 : index
    %11 = vector.load %arg18[%c0_22, %c0_23] : memref<4x1xf32, #tpu.memory_space<vmem>>, vector<4x1xf32>
    %c0_24 = arith.constant 0 : index
    %c0_25 = arith.constant 0 : index
    %12 = vector.load %arg19[%c0_24, %c0_25] : memref<8x4xf32, #tpu.memory_space<vmem>>, vector<8x4xf32>
    %c0_26 = arith.constant 0 : index
    %c0_27 = arith.constant 0 : index
    %13 = vector.load %arg20[%c0_26, %c0_27] : memref<8x1xf32, #tpu.memory_space<vmem>>, vector<8x1xf32>
    %c0_28 = arith.constant 0 : index
    %c0_29 = arith.constant 0 : index
    %c0_30 = arith.constant 0 : index
    %14 = vector.load %arg1[%c0_28, %c0_29, %c0_30] : memref<1x8x32xf32, #tpu.memory_space<vmem>>, vector<1x8x32xf32>
    %15 = vector.shape_cast %14 : vector<1x8x32xf32> to vector<8x32xf32>
    %c0_31 = arith.constant 0 : index
    %c0_32 = arith.constant 0 : index
    %16 = vector.load %arg2[%c0_31, %c0_32] : memref<1x16xi32, #tpu.memory_space<vmem>>, vector<1x16xi32>
    %c0_33 = arith.constant 0 : index
    %c0_34 = arith.constant 0 : index
    %17 = vector.load %arg3[%c0_33, %c0_34] : memref<16x2xf32, #tpu.memory_space<vmem>>, vector<16x2xf32>
    %c0_35 = arith.constant 0 : index
    %c0_36 = arith.constant 0 : index
    %18 = vector.load %arg4[%c0_35, %c0_36] : memref<2x16xf32, #tpu.memory_space<vmem>>, vector<2x16xf32>
    %cst = arith.constant dense<0.000000e+00> : vector<8x32xf32>
    %19 = tpu.matmul %0, %15, %cst {dimension_numbers = #tpu.dot_dimension_numbers<[1], [0], [0], [1], [0, 0, 1, 1], [], []>} : vector<8x8xf32>, vector<8x32xf32>, vector<8x32xf32> -> vector<8x32xf32>
    %20 = vector.broadcast %1 : vector<8x1xf32> to vector<8x32xf32>
    %21 = arith.addf %19, %20 : vector<8x32xf32>
    %22 = vector.broadcast %2 : vector<8x1xf32> to vector<8x32xf32>
    %23 = arith.mulf %21, %22 : vector<8x32xf32>
    %24 = vector.broadcast %3 : vector<8x1xf32> to vector<8x32xf32>
    %25 = arith.addf %23, %24 : vector<8x32xf32>
    %26 = arith.negf %25 : vector<8x32xf32>
    %27 = math.exp %26 : vector<8x32xf32>
    %cst_37 = arith.constant 1.000000e+00 : f32
    %28 = vector.broadcast %cst_37 : f32 to vector<8x32xf32>
    %29 = arith.addf %28, %27 : vector<8x32xf32>
    %30 = arith.divf %28, %29 : vector<8x32xf32>
    %31 = arith.mulf %25, %30 : vector<8x32xf32>
    %32 = vector.extract_strided_slice %31 {offsets = [0, 0], sizes = [8, 16], strides = [1, 1]} : vector<8x32xf32> to vector<8x16xf32>
    %33 = vector.extract_strided_slice %4 {offsets = [0, 0, 0], sizes = [1, 8, 8], strides = [1, 1, 1]} : vector<3x8x8xf32> to vector<1x8x8xf32>
    %34 = vector.shape_cast %33 : vector<1x8x8xf32> to vector<8x8xf32>
    %cst_38 = arith.constant dense<0.000000e+00> : vector<8x16xf32>
    %35 = tpu.matmul %34, %32, %cst_38 {dimension_numbers = #tpu.dot_dimension_numbers<[1], [0], [0], [1], [0, 0, 1, 1], [], []>} : vector<8x8xf32>, vector<8x16xf32>, vector<8x16xf32> -> vector<8x16xf32>
    %36 = vector.extract_strided_slice %31 {offsets = [0, 16], sizes = [8, 16], strides = [1, 1]} : vector<8x32xf32> to vector<8x16xf32>
    %37 = vector.extract_strided_slice %4 {offsets = [1, 0, 0], sizes = [1, 8, 8], strides = [1, 1, 1]} : vector<3x8x8xf32> to vector<1x8x8xf32>
    %38 = vector.shape_cast %37 : vector<1x8x8xf32> to vector<8x8xf32>
    %cst_39 = arith.constant dense<0.000000e+00> : vector<8x16xf32>
    %39 = tpu.matmul %38, %36, %cst_39 {dimension_numbers = #tpu.dot_dimension_numbers<[1], [0], [0], [1], [0, 0, 1, 1], [], []>} : vector<8x8xf32>, vector<8x16xf32>, vector<8x16xf32> -> vector<8x16xf32>
    %40 = arith.addf %35, %39 : vector<8x16xf32>
    %41 = vector.extract_strided_slice %31 {offsets = [0, 0], sizes = [8, 16], strides = [1, 1]} : vector<8x32xf32> to vector<8x16xf32>
    %42 = vector.extract_strided_slice %41 {offsets = [0, 1], sizes = [8, 15], strides = [1, 1]} : vector<8x16xf32> to vector<8x15xf32>
    %43 = vector.extract_strided_slice %41 {offsets = [0, 0], sizes = [8, 1], strides = [1, 1]} : vector<8x16xf32> to vector<8x1xf32>
    %44 = tpu.concatenate %42, %43 in 1 : vector<8x15xf32>, vector<8x1xf32> -> vector<8x16xf32>
    %c1_i32 = arith.constant 1 : i32
    %45 = vector.broadcast %c1_i32 : i32 to vector<1x16xi32>
    %46 = arith.addi %16, %45 : vector<1x16xi32>
    %c0_i32 = arith.constant 0 : i32
    %47 = vector.broadcast %c0_i32 : i32 to vector<1x16xi32>
    %48 = arith.cmpi sge, %46, %47 : vector<1x16xi32>
    %c8_i32 = arith.constant 8 : i32
    %49 = vector.broadcast %c8_i32 : i32 to vector<1x16xi32>
    %50 = arith.cmpi slt, %46, %49 : vector<1x16xi32>
    %51 = arith.andi %48, %50 : vector<1x16xi1>
    %cst_40 = arith.constant 0.000000e+00 : f32
    %52 = vector.shape_cast %51 : vector<1x16xi1> to vector<1x16xi1>
    %53 = vector.broadcast %52 : vector<1x16xi1> to vector<8x16xi1>
    %54 = vector.broadcast %cst_40 : f32 to vector<8x16xf32>
    %55 = arith.select %53, %44, %54 : vector<8x16xi1>, vector<8x16xf32>
    %56 = vector.extract_strided_slice %4 {offsets = [2, 0, 0], sizes = [1, 8, 8], strides = [1, 1, 1]} : vector<3x8x8xf32> to vector<1x8x8xf32>
    %57 = vector.shape_cast %56 : vector<1x8x8xf32> to vector<8x8xf32>
    %cst_41 = arith.constant dense<0.000000e+00> : vector<8x16xf32>
    %58 = tpu.matmul %57, %55, %cst_41 {dimension_numbers = #tpu.dot_dimension_numbers<[1], [0], [0], [1], [0, 0, 1, 1], [], []>} : vector<8x8xf32>, vector<8x16xf32>, vector<8x16xf32> -> vector<8x16xf32>
    %59 = arith.addf %40, %58 : vector<8x16xf32>
    %60 = vector.broadcast %5 : vector<8x1xf32> to vector<8x16xf32>
    %61 = arith.addf %59, %60 : vector<8x16xf32>
    %62 = vector.broadcast %6 : vector<8x1xf32> to vector<8x16xf32>
    %63 = arith.mulf %61, %62 : vector<8x16xf32>
    %64 = vector.broadcast %7 : vector<8x1xf32> to vector<8x16xf32>
    %65 = arith.addf %63, %64 : vector<8x16xf32>
    %66 = arith.negf %65 : vector<8x16xf32>
    %67 = math.exp %66 : vector<8x16xf32>
    %cst_42 = arith.constant 1.000000e+00 : f32
    %68 = vector.broadcast %cst_42 : f32 to vector<8x16xf32>
    %69 = arith.addf %68, %67 : vector<8x16xf32>
    %70 = arith.divf %68, %69 : vector<8x16xf32>
    %71 = arith.mulf %65, %70 : vector<8x16xf32>
    %cst_43 = arith.constant dense<0.000000e+00> : vector<8x16xf32>
    %72 = tpu.matmul %8, %71, %cst_43 {dimension_numbers = #tpu.dot_dimension_numbers<[1], [0], [0], [1], [0, 0, 1, 1], [], []>} : vector<8x8xf32>, vector<8x16xf32>, vector<8x16xf32> -> vector<8x16xf32>
    %73 = vector.broadcast %9 : vector<8x1xf32> to vector<8x16xf32>
    %74 = arith.addf %72, %73 : vector<8x16xf32>
    %cst_44 = arith.constant dense<0.000000e+00> : vector<8x2xf32>
    %75 = tpu.matmul %74, %17, %cst_44 {dimension_numbers = #tpu.dot_dimension_numbers<[1], [0], [0], [1], [0, 0, 1, 1], [], []>} : vector<8x16xf32>, vector<16x2xf32>, vector<8x2xf32> -> vector<8x2xf32>
    %cst_45 = arith.constant dense<0.000000e+00> : vector<4x2xf32>
    %76 = tpu.matmul %10, %75, %cst_45 {dimension_numbers = #tpu.dot_dimension_numbers<[1], [0], [0], [1], [0, 0, 1, 1], [], []>} : vector<4x8xf32>, vector<8x2xf32>, vector<4x2xf32> -> vector<4x2xf32>
    %77 = vector.broadcast %11 : vector<4x1xf32> to vector<4x2xf32>
    %78 = arith.addf %76, %77 : vector<4x2xf32>
    %79 = arith.negf %78 : vector<4x2xf32>
    %80 = math.exp %79 : vector<4x2xf32>
    %cst_46 = arith.constant 1.000000e+00 : f32
    %81 = vector.broadcast %cst_46 : f32 to vector<4x2xf32>
    %82 = arith.addf %81, %80 : vector<4x2xf32>
    %83 = arith.divf %81, %82 : vector<4x2xf32>
    %84 = arith.mulf %78, %83 : vector<4x2xf32>
    %cst_47 = arith.constant dense<0.000000e+00> : vector<8x2xf32>
    %85 = tpu.matmul %12, %84, %cst_47 {dimension_numbers = #tpu.dot_dimension_numbers<[1], [0], [0], [1], [0, 0, 1, 1], [], []>} : vector<8x4xf32>, vector<4x2xf32>, vector<8x2xf32> -> vector<8x2xf32>
    %86 = vector.broadcast %13 : vector<8x1xf32> to vector<8x2xf32>
    %87 = arith.addf %85, %86 : vector<8x2xf32>
    %88 = arith.negf %87 : vector<8x2xf32>
    %89 = math.exp %88 : vector<8x2xf32>
    %cst_48 = arith.constant 1.000000e+00 : f32
    %90 = vector.broadcast %cst_48 : f32 to vector<8x2xf32>
    %91 = arith.addf %90, %89 : vector<8x2xf32>
    %92 = arith.divf %90, %91 : vector<8x2xf32>
    %cst_49 = arith.constant dense<0.000000e+00> : vector<8x16xf32>
    %93 = tpu.matmul %92, %18, %cst_49 {dimension_numbers = #tpu.dot_dimension_numbers<[1], [0], [0], [1], [0, 0, 1, 1], [], []>} : vector<8x2xf32>, vector<2x16xf32>, vector<8x16xf32> -> vector<8x16xf32>
    %94 = arith.mulf %74, %93 : vector<8x16xf32>
    %95 = vector.extract_strided_slice %15 {offsets = [0, 0], sizes = [8, 16], strides = [1, 1]} : vector<8x32xf32> to vector<8x16xf32>
    %96 = vector.extract_strided_slice %15 {offsets = [0, 16], sizes = [8, 16], strides = [1, 1]} : vector<8x32xf32> to vector<8x16xf32>
    %97 = arith.maximumf %95, %96 : vector<8x16xf32>
    %98 = arith.addf %94, %97 : vector<8x16xf32>
    %c0_50 = arith.constant 0 : index
    %c0_51 = arith.constant 0 : index
    %c0_52 = arith.constant 0 : index
    %99 = vector.load %arg21[%c0_50, %c0_51, %c0_52] : memref<1x8x16xf32, #tpu.memory_space<vmem>>, vector<1x8x16xf32>
    %100 = vector.shape_cast %99 : vector<1x8x16xf32> to vector<8x16xf32>
    %101 = vector.shape_cast %98 : vector<8x16xf32> to vector<1x8x16xf32>
    tpu.vector_store %arg21[%c0_50, %c0_51, %c0_52], %101 {strides = array<i32>} : memref<1x8x16xf32, #tpu.memory_space<vmem>>, vector<1x8x16xf32>,
    return
  }
  func.func @transform_0(%arg0: i32) -> (i32, i32, i32) {
    %c0_i32 = arith.constant 0 : i32
    %c0_i32_0 = arith.constant 0 : i32
    %c0_i32_1 = arith.constant 0 : i32
    return %arg0, %c0_i32, %c0_i32_0 : i32, i32, i32
  }
  func.func @transform_1(%arg0: i32) -> (i32, i32) {
    %c0_i32 = arith.constant 0 : i32
    %c0_i32_0 = arith.constant 0 : i32
    %c0_i32_1 = arith.constant 0 : i32
    return %c0_i32, %c0_i32_0 : i32, i32
  }
  func.func @transform_2(%arg0: i32) -> (i32, i32) {
    %c0_i32 = arith.constant 0 : i32
    %c0_i32_0 = arith.constant 0 : i32
    %c0_i32_1 = arith.constant 0 : i32
    return %c0_i32, %c0_i32_0 : i32, i32
  }
  func.func @transform_3(%arg0: i32) -> (i32, i32) {
    %c0_i32 = arith.constant 0 : i32
    %c0_i32_0 = arith.constant 0 : i32
    %c0_i32_1 = arith.constant 0 : i32
    return %c0_i32, %c0_i32_0 : i32, i32
  }
  func.func @transform_4(%arg0: i32) -> (i32, i32) {
    %c0_i32 = arith.constant 0 : i32
    %c0_i32_0 = arith.constant 0 : i32
    %c0_i32_1 = arith.constant 0 : i32
    return %c0_i32, %c0_i32_0 : i32, i32
  }
  func.func @transform_5(%arg0: i32) -> (i32, i32) {
    %c0_i32 = arith.constant 0 : i32
    %c0_i32_0 = arith.constant 0 : i32
    %c0_i32_1 = arith.constant 0 : i32
    return %c0_i32, %c0_i32_0 : i32, i32
  }
  func.func @transform_6(%arg0: i32) -> (i32, i32) {
    %c0_i32 = arith.constant 0 : i32
    %c0_i32_0 = arith.constant 0 : i32
    %c0_i32_1 = arith.constant 0 : i32
    return %c0_i32, %c0_i32_0 : i32, i32
  }
  func.func @transform_7(%arg0: i32) -> (i32, i32) {
    %c0_i32 = arith.constant 0 : i32
    %c0_i32_0 = arith.constant 0 : i32
    %c0_i32_1 = arith.constant 0 : i32
    return %c0_i32, %c0_i32_0 : i32, i32
  }
  func.func @transform_8(%arg0: i32) -> (i32, i32) {
    %c0_i32 = arith.constant 0 : i32
    %c0_i32_0 = arith.constant 0 : i32
    %c0_i32_1 = arith.constant 0 : i32
    return %c0_i32, %c0_i32_0 : i32, i32
  }
  func.func @transform_9(%arg0: i32) -> (i32, i32) {
    %c0_i32 = arith.constant 0 : i32
    %c0_i32_0 = arith.constant 0 : i32
    %c0_i32_1 = arith.constant 0 : i32
    return %c0_i32, %c0_i32_0 : i32, i32
  }
  func.func @transform_10(%arg0: i32) -> (i32, i32, i32) {
    %c0_i32 = arith.constant 0 : i32
    %c0_i32_0 = arith.constant 0 : i32
    %c0_i32_1 = arith.constant 0 : i32
    %c0_i32_2 = arith.constant 0 : i32
    return %c0_i32, %c0_i32_0, %c0_i32_1 : i32, i32, i32
  }
  func.func @transform_11(%arg0: i32) -> (i32, i32) {
    %c0_i32 = arith.constant 0 : i32
    %c0_i32_0 = arith.constant 0 : i32
    %c0_i32_1 = arith.constant 0 : i32
    return %c0_i32, %c0_i32_0 : i32, i32
  }
  func.func @transform_12(%arg0: i32) -> (i32, i32) {
    %c0_i32 = arith.constant 0 : i32
    %c0_i32_0 = arith.constant 0 : i32
    %c0_i32_1 = arith.constant 0 : i32
    return %c0_i32, %c0_i32_0 : i32, i32
  }
  func.func @transform_13(%arg0: i32) -> (i32, i32) {
    %c0_i32 = arith.constant 0 : i32
    %c0_i32_0 = arith.constant 0 : i32
    %c0_i32_1 = arith.constant 0 : i32
    return %c0_i32, %c0_i32_0 : i32, i32
  }
  func.func @transform_14(%arg0: i32) -> (i32, i32) {
    %c0_i32 = arith.constant 0 : i32
    %c0_i32_0 = arith.constant 0 : i32
    %c0_i32_1 = arith.constant 0 : i32
    return %c0_i32, %c0_i32_0 : i32, i32
  }
  func.func @transform_15(%arg0: i32) -> (i32, i32) {
    %c0_i32 = arith.constant 0 : i32
    %c0_i32_0 = arith.constant 0 : i32
    %c0_i32_1 = arith.constant 0 : i32
    return %c0_i32, %c0_i32_0 : i32, i32
  }
  func.func @transform_16(%arg0: i32) -> (i32, i32) {
    %c0_i32 = arith.constant 0 : i32
    %c0_i32_0 = arith.constant 0 : i32
    %c0_i32_1 = arith.constant 0 : i32
    return %c0_i32, %c0_i32_0 : i32, i32
  }
  func.func @transform_17(%arg0: i32) -> (i32, i32) {
    %c0_i32 = arith.constant 0 : i32
    %c0_i32_0 = arith.constant 0 : i32
    %c0_i32_1 = arith.constant 0 : i32
    return %c0_i32, %c0_i32_0 : i32, i32
  }
  func.func @transform_18(%arg0: i32) -> (i32, i32) {
    %c0_i32 = arith.constant 0 : i32
    %c0_i32_0 = arith.constant 0 : i32
    %c0_i32_1 = arith.constant 0 : i32
    return %c0_i32, %c0_i32_0 : i32, i32
  }
  func.func @transform_19(%arg0: i32) -> (i32, i32) {
    %c0_i32 = arith.constant 0 : i32
    %c0_i32_0 = arith.constant 0 : i32
    %c0_i32_1 = arith.constant 0 : i32
    return %c0_i32, %c0_i32_0 : i32, i32
  }
  func.func @transform_20(%arg0: i32) -> (i32, i32, i32) {
    %c0_i32 = arith.constant 0 : i32
    %c0_i32_0 = arith.constant 0 : i32
    %c0_i32_1 = arith.constant 0 : i32
    return %arg0, %c0_i32, %c0_i32_0 : i32, i32, i32
  }
}

</mosaic_0001>

<bundles_post_ra>
// kernel: tpu_custom_call.1
= control target key start
LH: loop header
LB: loop body
LE: loop exit
PB: predicated region body
PF: predicated region fallthrough
CT: control target
= control target key end

     0   :  { %s1241_s0 = inlined_call_operand.vmem [shape: f32[1,8,32], index: 0, kind: input, shape index: {}]   ;;  %s1242_s1 = inlined_call_operand.vmem [shape: s32[1,16], index: 1, kind: input, shape index: {}]   ;;  %s1243_s2 = inlined_call_operand.vmem [shape: f32[16,2], index: 2, kind: input, shape index: {}]   ;;  %s1244_s3 = inlined_call_operand.vmem [shape: f32[2,16], index: 3, kind: input, shape index: {}]   ;;  %s1245_s4 = inlined_call_operand.vmem [shape: f32[8,1], index: 4, kind: input, shape index: {}]   ;;  %s1246_s5 = inlined_call_operand.vmem [shape: f32[8,1], index: 5, kind: input, shape index: {}]   ;;  %s1247_s6 = inlined_call_operand.vmem [shape: f32[8,8], index: 6, kind: input, shape index: {}]   ;;  %s1248_s7 = inlined_call_operand.vmem [shape: f32[8,1], index: 7, kind: input, shape index: {}]   ;;  %s1249_s8 = inlined_call_operand.vmem [shape: f32[8,1], index: 8, kind: input, shape index: {}]   ;;  %s1250_s9 = inlined_call_operand.vmem [shape: f32[8,1], index: 9, kind: input, shape index: {}]   ;;  %s1251_s10 = inlined_call_operand.vmem [shape: f32[3,8,8], index: 10, kind: input, shape index: {}]   ;;  %s1252_s11 = inlined_call_operand.vmem [shape: f32[8,1], index: 11, kind: input, shape index: {}]   ;;  %s1253_s12 = inlined_call_operand.vmem [shape: f32[8,1], index: 12, kind: input, shape index: {}]   ;;  %s1254_s13 = inlined_call_operand.vmem [shape: f32[8,1], index: 13, kind: input, shape index: {}]   ;;  %s1255_s14 = inlined_call_operand.vmem [shape: f32[8,8], index: 14, kind: input, shape index: {}]   ;;  %s1256_s15 = inlined_call_operand.vmem [shape: f32[8,1], index: 15, kind: input, shape index: {}]   ;;  %s1257_s16 = inlined_call_operand.vmem [shape: f32[4,8], index: 16, kind: input, shape index: {}]   ;;  %s1258_s17 = inlined_call_operand.vmem [shape: f32[4,1], index: 17, kind: input, shape index: {}]   ;;  %s1259_s18 = inlined_call_operand.vmem [shape: f32[8,4], index: 18, kind: input, shape index: {}]   ;;  %s1260_s19 = inlined_call_operand.vmem [shape: f32[8,1], index: 19, kind: input, shape index: {}]   ;;  %s1261_s20 = inlined_call_operand.hbm [shape: f32[1,8,16], index: 20, kind: output, shape index: {}]  }
   0x1   :  { %1263 = sst [smem:[#allocation5_spill]] %s1241_s0 }
   0x2   :  { %1264 = sst [smem:[#allocation6_spill]] %s1242_s1 }
   0x3   :  { %1265 = sst [smem:[#allocation7_spill]] %s1243_s2 }
   0x4   :  { %1266 = sst [smem:[#allocation8_spill]] %s1244_s3 }
   0x5   :  { %s1267_s21 = sld [smem:[#allocation5_spill]]  ;;  %v66_v1 = vld [vmem:[%s1247_s6] sm:$0xff]  ;;  %vm92_vm0 = vcmask 64512   ;;  %v1014_v2 = vmov 0.0   ;;  %vm1015_vm1 = vmmov 0   ;;  %v1016_v4 = vmov 0  }
   0x6   :  { %914 = vmatprep.subr.mxu0 %v1014_v2  ;;  %916 = vmatprep.mubr.msk.f32.mxu0 %vm1015_vm1, %v1014_v2  ;;  %v67_v3 = vld [vmem:[%s1248_s7] sm:$0xff] }
   0x7   :  { %972 = vset.pattern.permute.xlu0 %v1016_v4  ;;  %v69_v5 = vld [vmem:[%s1250_s9] sm:$0xff] }
   0xb   :  { %v1130_v0 = vld [vmem:[%s1267_s21] sm:$0xff] }
   0xc   :  { %915 = vmatpush3.msra.mxu0 %v1130_v0 }
   0xd   :  { %25 = vsyncpa [#allocation3], 0  ;;  %917 = vmatmul.mubr.msk.f32.vlgmr.msra.gmra.mrb[0].mxu0 %vm92_vm0, %v66_v1  ;;  %89 = vperm.xlu0 %972, %v67_v3   ;;  %v68_v6 = vld [vmem:[%s1249_s8] sm:$0xff]  ;;  %s1017_s9 = smov 127   ;;  %s1018_s27 = smov 112   ;;  %v348_v29 = vlaneseq  ;;  %v71_v34 = vld [vmem:[%s1251_s10 + $0x8] sm:$0xff] }
   0xe   :  { %973 = vset.pattern.permute.xlu1 %v1016_v4  ;;  %924 = vmatprep.subr.mxu0 %v1014_v2  ;;  %v70_v20 = vld [vmem:[%s1251_s10] sm:$0xff]  ;;  %s1019_s29 = smov 15   ;;  %s1268_s3 = sld [smem:[#allocation6_spill]]  ;;  %vm341_vm5 = vcmask 121856   ;;  %v72_v38 = vld [vmem:[%s1251_s10 + $0x10] sm:$0xff]  ;;  %v1020_v42 = vmov 0.0|0.0  }
   0xf   :  { %174 = vperm.xlu1 %973, %v69_v5   ;;  %919 = vmatprep.subr.mxu1 %v1014_v2  ;;  %v73_v21 = vld [vmem:[%s1252_s11] sm:$0xff]  ;;  %v349_v30 = vshrl.u32 %v348_v29, 7  ;;  %s1269_s8 = sld [smem:[#allocation7_spill]]  ;;  %vm531_vm7 = vcmask 130048   ;;  %vm699_vm8 = vcmask 1043456   ;;  %vm695_vm9 = vcmask 31744  }
  0x10   :  { %921 = vmatprep.mubr.msk.f32.mxu1 %vm1015_vm1, %v1014_v2  ;;  %926 = vmatprep.mubr.msk.f32.mxu0 %vm1015_vm1, %v1014_v2  ;;  %v75_v22 = vld [vmem:[%s1254_s13] sm:$0xff]  ;;  %s1270_s0 = sld [smem:[#allocation8_spill]]  ;;  %vm783_vm10 = vcmask 1041408   ;;  %vm779_vm11 = vcmask 15360  }
  0x11   :  { %168 = vperm.xlu0 %972, %v68_v6   ;;  %v74_v23 = vld [vmem:[%s1253_s12] sm:$0xff]  ;;  %v350_v31 = vsub.s32 0, %v349_v30 }
  0x12   :  { %v79_v24 = vld [vmem:[%s1258_s17] sm:$0xf] }
  0x13   :  { %v77_v25 = vld [vmem:[%s1256_s15] sm:$0xff] }
  0x14   :  { %v81_v26 = vld [vmem:[%s1260_s19] sm:$0xff] }
  0x15   :  { %v83_v27 = vld [vmem:[%s1268_s3] sm:$0x1]  ;;  %v85_v62 = vld [vmem:[%s1269_s8 + $0x8] sm:$0xff] }
  0x16   :  { %v343_v28 = vadd.s32 1, %v83_v27  ;;  %v76_v60 = vld [vmem:[%s1255_s14] sm:$0xff] }
  0x17   :  { %v84_v61 = vld [vmem:[%s1269_s8] sm:$0xff] }
  0x18   :  { %vm344_vm2 = vcmp.ge.s32.totalorder %v343_v28, 0  ;;  %vm345_vm3 = vcmp.lt.s32.totalorder %v343_v28, 8  ;;  %v962_v63 = vpack.c.bf16 %v85_v62, %v84_v61  ;;  %v78_v6 = vld [vmem:[%s1257_s16] sm:$0xf] }
  0x19   :  { %vm346_vm4 = vmand %vm344_vm2, %vm345_vm3 }
  0x1a   :  { %v347_v32 = vsel %vm346_vm4, 1, %v1016_v4 }
  0x1b   :  { %v351_v33 = vrot.slane %v347_v32, %v350_v31 }
  0x1d   :  { %vm352_vm6 = vcmp.eq.s32.totalorder %v351_v33, 1 }
  0x8c   :  { %v90_v7 = vpop.permute.xlu0 %89 }
  0x8e   :  { %v175_v12 = vpop.permute.xlu1 %174 }
  0x90   :  { %v169_v11 = vpop.permute.xlu0 %168 }
  0xe0   :  { %v162_v8 = vpop.f32.mrb[0].mxu0 }
  0xe1   :  { %v163_v9 = vadd.f32 %v162_v8, %v90_v7  ;;  %v918_v10 = vpop.f32.mrb[1].mxu0 }
  0xe3   :  { %v171_v13 = vmul.f32 %v169_v11, %v163_v9 }
  0xe5   :  { %v177_v14 = vadd.f32 %v175_v12, %v171_v13 }
  0xe7   :  { %v880_v15 = vmul.f32 -1.442695, %v177_v14 }
  0xe9   :  { %974 = vpow2.f32 %v880_v15 }
  0xf3   :  { %v975_v16 = vpop.eup %974 }
  0xf4   :  { %v181_v17 = vadd.f32 1.0, %v975_v16 }
  0xf6   :  { %976 = vrcp.f32 %v181_v17 }
 0x100   :  { %v977_v18 = vpop.eup %976 }
 0x101   :  { %v184_v19 = vmul.f32 %v977_v18, %v177_v14  ;;  %v80_v18 = vld [vmem:[%s1259_s18] sm:$0xff]  ;;  %s1021_s18 = smov [#allocation2]  }
 0x102   :  { %s871_s5 = sshll.u32 %s1021_s18, 4  ;;  %s872_s5 = int_to_ptr.vmem [resolvable:$true] %s871_s5 }
 0x103   :  { %335 = vrot.lane.b32.xlu0 %v184_v19, %s1017_s9  ;;  %186 = vrot.lane.b32.xlu1 %v184_v19, %s1018_s27  ;;  %s990_s1 = scalar_lea.vmem %s872_s5, 128  ;;  %p995_p1 = scmp.lt.s32.totalorder %s872_s5, %s872_s5 }
 0x104   :  { %925 = vmatpush3.msra.mxu0 %v184_v19  ;;  %p991_p0 = scmp.ne.s32.totalorder %s872_s5, %s990_s1  ;;  %p996_p2 = scmp.lt.s32.totalorder %s990_s1, %s990_s1 }
 0x105   :  { %927 = vmatmul.mubr.msk.f32.vlgmr.msra.gmra.mrb[2].mxu0 %vm92_vm0, %v70_v20  ;;  %934 = vmatprep.subr.mxu0 %v1014_v2 }
 0x106   :  { %936 = vmatprep.mubr.msk.f32.mxu0 %vm1015_vm1, %v1014_v2  ;;  %p997_p3 = por %p996_p2, %p995_p1 }
 0x107   :  { %430 = vperm.xlu0 %972, %v73_v21   ;;  %338 = vrot.lane.b32.xlu1 %v184_v19, %s1019_s29 }
 0x108   :  { %p998_p4 = pnand %p997_p3, %p991_p0 }
 0x10b   :  { %442 = vperm.xlu0 %972, %v75_v22   ;;  %436 = vperm.xlu1 %973, %v74_v23  }
 0x10f   :  { %607 = vperm.xlu0 %972, %v79_v24   ;;  %455 = vperm.xlu1 %973, %v77_v25  }
 0x113   :  { %692 = vperm.xlu1 %973, %v81_v26   ;;  %859 = vrot.lane.b32.xlu0 %v1130_v0, %s1018_s27 }
 0x175   :  { %v187_v35 = vpop.permute.xlu1 %186  ;;  %v336_v36 = vpop.permute.xlu0 %335 }
 0x176   :  { %920 = vmatpush3.msra.mxu1 %v187_v35 }
 0x177   :  { %922 = vmatmul.mubr.msk.f32.vlgmr.msra.gmra.mrb[0].mxu1 %vm92_vm0, %v71_v34  ;;  %929 = vmatprep.subr.mxu1 %v1014_v2 }
 0x178   :  { %931 = vmatprep.mubr.msk.f32.mxu1 %vm1015_vm1, %v1014_v2 }
 0x179   :  { %v339_v37 = vpop.permute.xlu1 %338 }
 0x17a   :  { %v342_v39 = vsel %vm341_vm5, %v336_v36, %v339_v37 }
 0x17b   :  { %930 = vmatpush3.msk.msra.mxu1 %vm352_vm6, %v342_v39 }
 0x17c   :  { %932 = vmatmul.mubr.msk.f32.vlgmr.msra.gmra.mrb[2].mxu1 %vm92_vm0, %v72_v38  ;;  %961 = vmatprep.subr.bf16.mxu1 %v1020_v42 }
 0x17d   :  { %943 = vmatprep.mubr.msk.f32.mxu1 %vm1015_vm1, %v1014_v2  ;;  %963 = vmatpush3.bf16.msra.mxu1 %v962_v63 }
 0x17e   :  { %951 = vmatprep.subr.mxu1 %v1014_v2 }
 0x186   :  { %v431_v46 = vpop.permute.xlu0 %430 }
 0x18a   :  { %v437_v51 = vpop.permute.xlu1 %436  ;;  %v443_v53 = vpop.permute.xlu0 %442 }
 0x18e   :  { %v456_v1 = vpop.permute.xlu1 %455  ;;  %v608_v9 = vpop.permute.xlu0 %607 }
 0x192   :  { %v693_v19 = vpop.permute.xlu1 %692  ;;  %v860_v27 = vpop.permute.xlu0 %859 }
 0x193   :  { %v862_v28 = vmax.f32 %v1130_v0, %v860_v27 }
 0x1d8   :  { %v331_v40 = vpop.f32.mrb[2].mxu0 }
 0x1d9   :  { %v928_v41 = vpop.f32.mrb[3].mxu0 }
 0x24a   :  { %v258_v43 = vpop.f32.mrb[0].mxu1 }
 0x24b   :  { %v923_v44 = vpop.f32.mrb[1].mxu1  ;;  %v332_v45 = vadd.f32 %v331_v40, %v258_v43 }
 0x24f   :  { %v423_v47 = vpop.f32.mrb[2].mxu1 }
 0x250   :  { %v427_v48 = vadd.f32 %v423_v47, %v332_v45  ;;  %v933_v49 = vpop.f32.mrb[3].mxu1 }
 0x252   :  { %v433_v50 = vadd.f32 %v431_v46, %v427_v48 }
 0x254   :  { %v439_v52 = vmul.f32 %v437_v51, %v433_v50 }
 0x256   :  { %v445_v54 = vadd.f32 %v443_v53, %v439_v52 }
 0x258   :  { %v885_v55 = vmul.f32 -1.442695, %v445_v54 }
 0x25a   :  { %978 = vpow2.f32 %v885_v55 }
 0x264   :  { %v979_v56 = vpop.eup %978 }
 0x265   :  { %v449_v57 = vadd.f32 1.0, %v979_v56 }
 0x267   :  { %980 = vrcp.f32 %v449_v57 }
 0x271   :  { %v981_v58 = vpop.eup %980 }
 0x272   :  { %v452_v59 = vmul.f32 %v981_v58, %v445_v54 }
 0x274   :  { %935 = vmatpush3.msra.mxu0 %v452_v59 }
 0x275   :  { %937 = vmatmul.mubr.msk.f32.vlgmr.msra.gmra.mrb[4].mxu0 %vm92_vm0, %v76_v60  ;;  %946 = vmatprep.subr.mxu0 %v1014_v2 }
 0x276   :  { %948 = vmatprep.mubr.msk.f32.mxu0 %vm1015_vm1, %v1014_v2 }
 0x348   :  { %v527_v3 = vpop.f32.mrb[4].mxu0 }
 0x349   :  { %v528_v4 = vadd.f32 %v527_v3, %v456_v1  ;;  %v938_v5 = vpop.f32.mrb[5].mxu0 }
 0x34b   :  { %944 = vmatmul.mubr.msk.f32.vlgmr.msra.gmra.mrb[4].mxu1 %vm531_vm7, %v528_v4 }
 0x34c   :  { %953 = vmatprep.mubr.msk.f32.mxu1 %vm1015_vm1, %v1014_v2 }
 0x41e   :  { %v601_v7 = vpop.f32.mrb[4].mxu1 }
 0x41f   :  { %v945_v8 = vpop.f32.mrb[5].mxu1  ;;  %947 = vmatpush3.msra.mxu0 %v601_v7 }
 0x420   :  { %949 = vmatmul.mubr.msk.f32.vlgmr.msra.gmra.mrb[6].mxu0 %vm92_vm0, %v78_v6  ;;  %956 = vmatprep.subr.mxu0 %v1014_v2 }
 0x421   :  { %958 = vmatprep.mubr.msk.f32.mxu0 %vm1015_vm1, %v1014_v2  ;;  %v86_v2 = vld [vmem:[%s1270_s0] sm:$0x3] }
 0x422   :  { %957 = vmatpush3.msk.msra.mxu0 %vm783_vm10, %v86_v2 }
 0x4f3   :  { %v679_v10 = vpop.f32.mrb[6].mxu0 }
 0x4f4   :  { %v680_v11 = vadd.f32 %v679_v10, %v608_v9  ;;  %v950_v12 = vpop.f32.mrb[7].mxu0 }
 0x4f6   :  { %v889_v13 = vmul.f32 -1.442695, %v680_v11 }
 0x4f8   :  { %982 = vpow2.f32 %v889_v13 }
 0x502   :  { %v983_v14 = vpop.eup %982 }
 0x503   :  { %v686_v15 = vadd.f32 1.0, %v983_v14 }
 0x505   :  { %984 = vrcp.f32 %v686_v15 }
 0x50f   :  { %v985_v16 = vpop.eup %984 }
 0x510   :  { %v689_v17 = vmul.f32 %v985_v16, %v680_v11 }
 0x512   :  { %952 = vmatpush3.msk.msra.mxu1 %vm699_vm8, %v689_v17 }
 0x513   :  { %954 = vmatmul.mubr.msk.f32.vlgmr.msra.gmra.mrb[6].mxu1 %vm695_vm9, %v80_v18 }
 0x5e6   :  { %v769_v20 = vpop.f32.mrb[6].mxu1 }
 0x5e7   :  { %v770_v21 = vadd.f32 %v769_v20, %v693_v19  ;;  %v955_v22 = vpop.f32.mrb[7].mxu1 }
 0x5e9   :  { %v892_v23 = vmul.f32 -1.442695, %v770_v21 }
 0x5eb   :  { %986 = vpow2.f32 %v892_v23 }
 0x5f5   :  { %v987_v24 = vpop.eup %986 }
 0x5f6   :  { %v776_v25 = vadd.f32 1.0, %v987_v24 }
 0x5f8   :  { %988 = vrcp.f32 %v776_v25 }
 0x602   :  { %v989_v26 = vpop.eup %988 }
 0x603   :  { %959 = vmatmul.mubr.msk.f32.vlgmr.msra.gmra.mrb[8].mxu0 %vm779_vm11, %v989_v26 }
 0x6d6   :  { %v853_v29 = vpop.f32.mrb[8].mxu0 }
 0x6d7   :  { %v857_v30 = vmul.f32 %v853_v29, %v528_v4  ;;  %v960_v31 = vpop.f32.mrb[9].mxu0 }
 0x6d9   :  { %v863_v32 = vadd.f32 %v862_v28, %v857_v30 }
 0x6db   :  { %864 = vst.msk [vmem:[#allocation2] sm:$0xff] %vm531_vm7, %v863_v32 }
 0x6dc   :  { %1001 = shalt.err (!%p998_p4)
}
 0x6dd   :  { %s1002_s22 = scalar_lea.hbm %s1261_s20, 128 }
 0x6de   :  { %p1003_p5 = scmp.ne.s32.totalorder %s1261_s20, %s1002_s22  ;;  %p1006_p6 = scmp.lt.u32.totalorder %s1002_s22, %s1261_s20 }
 0x6e0   :  { %p1008_p7 = pnand %p1006_p6, %p1003_p5 }
 0x6e2   :  { %1011 = shalt.err (!%p1008_p7)
}
 0x6e3   :  { %874 = dma.vmem_to_hbm [thread:$0]  %s872_s5, 128, %s1261_s20, [#allocation3]  }
 0x6e4   :  { %1012 = dma.done.wait [#allocation3], 128  }
 0x6e5   :  { %1013 = vsyncadd [#allocation3], 4294967168 }
 0x6e6   :  { %878 = vsyncpa [#allocation3], 1 }

</bundles_post_ra>
